<compile_context>
chip_gen: v6e
topology: v6e:2x2x1
jax: 0.10.0
libtpu: 0.0.40
codegen_flags: <defaults>
</compile_context>

<pallas_src>
import jax
import jax.numpy as jnp
from jax.experimental import pallas as pl
from jax.experimental.pallas import tpu as pltpu


def _spp_fusion_kernel(x_ref, m_ref, gamma_ref, beta_ref, out_ref, acc_ref):
    """One (channel-block, HW-block) grid step of the fused SPP reduction.

    x_ref     : (B, c_blk, l_blk)  input slab (NCHW-contiguous layout)
    m_ref     : (c_blk, l_blk)     folded pool+conv weight map (x dtype)
    gamma/beta: (1, c_blk)         BatchNorm1d affine parameters (f32)
    out_ref   : (B, c_blk)         output block
    acc_ref   : (B, c_blk) f32     VMEM accumulator, resident across HW blocks
    """
    li = pl.program_id(1)  # HW reduction axis (innermost, "arbitrary")

    @pl.when(li == 0)
    def _():
        acc_ref[...] = jnp.zeros_like(acc_ref)

    # Per-block upcast (block-sized, not whole-array); f32 accumulation.
    x = x_ref[...].astype(jnp.float32)           # (B, c_blk, l_blk)
    m = m_ref[...].astype(jnp.float32)           # (c_blk, l_blk)
    # Single weighted lane-reduce over the H*W axis.
    acc_ref[...] += jnp.sum(x * m[None, :, :], axis=-1)

    @pl.when(li == pl.num_programs(1) - 1)
    def _():
        spp = acc_ref[...]                        # (B, c_blk)
        # Training-mode BatchNorm1d (biased batch variance, eps=1e-5) + ReLU.
        # Stats are over the FULL batch (B never sharded) and per-channel, so
        # splitting channels across grid steps / cores stays exact.
        mean = jnp.mean(spp, axis=0, keepdims=True)
        var = jnp.mean((spp - mean) ** 2, axis=0, keepdims=True)
        y = (spp - mean) * jax.lax.rsqrt(var + 1e-5)
        y = y * gamma_ref[...] + beta_ref[...]
        out_ref[...] = jnp.maximum(y, 0.0).astype(out_ref.dtype)


def _build_weight_map(conv_weight, H, W):
    """Fold AdaptiveAvgPool(4/2/1) + depthwise Conv1d(k=21) into M[c, h*w].

    Tap order matches the PyTorch concat: taps 0-15 = 4x4 pool (row-major over
    (oh, ow)), taps 16-19 = 2x2 pool (row-major), tap 20 = 1x1 pool.
    """
    C = conv_weight.shape[0]
    w = conv_weight[:, 0, :].astype(jnp.float32)              # (C, 21)
    w4, w2, w1 = w[:, :16], w[:, 16:20], w[:, 20]
    th4, tw4 = H // 4, W // 4
    th2, tw2 = H // 2, W // 2
    hi = jnp.arange(H)
    wi = jnp.arange(W)
    tile4 = (hi[:, None] // th4) * 4 + (wi[None, :] // tw4)   # (H, W) in [0,16)
    tile2 = (hi[:, None] // th2) * 2 + (wi[None, :] // tw2)   # (H, W) in [0,4)
    M = (w4[:, tile4] / (th4 * tw4)
         + w2[:, tile2] / (th2 * tw2)
         + w1[:, None, None] / (H * W))                       # (C, H, W)
    return M.reshape(C, H * W)


def _round_up(v, m):
    return (v + m - 1) // m * m


def _pick_channel_block(C):
    """Largest 128-aligned divisor of C that is <= C//2 (=> >=2 parallel blocks).

    Falls back to the full channel extent when C has no such divisor (small or
    oddly shaped C); the (8,128)/last-dim==full-dim tiling rules stay satisfied
    either way.
    """
    if C % 128 != 0 or C < 256:
        return C
    best = 128
    cand = 256
    while cand <= C // 2:
        if C % cand == 0:
            best = cand
        cand += 128
    return best


def _pick_hw_block(Lp, bytes_per_l, target_bytes=12 << 20):
    """Largest multiple of 128 dividing Lp with per-step bytes <= target_bytes."""
    max_l = max(128, (target_bytes // max(bytes_per_l, 1)) // 128 * 128)
    best, cand = 128, 256
    limit = min(Lp, max_l)
    while cand <= limit:
        if Lp % cand == 0:
            best = cand
        cand += 128
    return best


def spp_fusion(x_nchw, conv_weight, bn_gamma, bn_beta):
    """x_nchw: (B, C, H, W); conv_weight: (C, 1, 21); bn_gamma/beta: (C,)."""
    B, C, H, W = x_nchw.shape
    # TODO(synk): non-divisible H/W would need PyTorch's uneven adaptive-pool bins;
    # only the exact (divisible) case is implemented here.
    assert H % 4 == 0 and W % 4 == 0, "exact adaptive pooling needs H, W % 4 == 0"
    L = H * W

    # Free, contiguous reshape of NCHW (no transpose; H*W is the lane axis).
    x = x_nchw.reshape(B, C, L)
    # Folded weight map, cast to the input dtype (kernel upcasts to f32).
    M = _build_weight_map(conv_weight, H, W).astype(x_nchw.dtype)  # (C, L)
    gamma = bn_gamma.reshape(1, C).astype(jnp.float32)
    beta = bn_beta.reshape(1, C).astype(jnp.float32)

    # Lane-align the reduction axis: zero-pad to a multiple of 128.  Padded
    # lanes carry M == 0, so the weighted reduction is unchanged.
    Lp = _round_up(L, 128)
    if Lp != L:
        x = jnp.pad(x, ((0, 0), (0, 0), (0, Lp - L)))
        M = jnp.pad(M, ((0, 0), (0, Lp - L)))

    # Channel blocking ("parallel" axis): >= 2 blocks whenever C allows, so
    # v7x's second TensorCore is not idle.  BN stats are per-channel over the
    # full batch, so a channel split is exact.
    c_blk = _pick_channel_block(C)
    nc = C // c_blk

    # HW blocking (reduction axis): size x + M per step against ~12 MiB so the
    # ~0.35 us per-grid-step overhead is well amortized on all generations,
    # while the double-buffered footprint stays under v7x's 64 MiB VMEM.
    x_itemsize = jnp.dtype(x.dtype).itemsize
    m_itemsize = jnp.dtype(M.dtype).itemsize
    bytes_per_l = (B * x_itemsize + m_itemsize) * c_blk
    l_blk = _pick_hw_block(Lp, bytes_per_l)
    nl = Lp // l_blk

    # Explicit VMEM budget: double-buffered (x + M) blocks + headroom for the
    # accumulator / params / internal scratch.  44 MiB cap leaves room under
    # v7x's 64 MiB physical VMEM; the explicit limit is load-bearing on v5e
    # (16 MiB default scoped VMEM).
    x_blk_bytes = B * c_blk * l_blk * x_itemsize
    m_blk_bytes = c_blk * l_blk * m_itemsize
    vmem_limit = int(min(max(2 * (x_blk_bytes + m_blk_bytes) + (2 << 20), 8 << 20),
                         44 << 20))

    grid_spec = pltpu.PrefetchScalarGridSpec(
        num_scalar_prefetch=0,
        grid=(nc, nl),
        in_specs=[
            pl.BlockSpec((B, c_blk, l_blk), lambda ci, li: (0, ci, li)),
            pl.BlockSpec((c_blk, l_blk), lambda ci, li: (ci, li)),
            pl.BlockSpec((1, c_blk), lambda ci, li: (0, ci)),
            pl.BlockSpec((1, c_blk), lambda ci, li: (0, ci)),
        ],
        out_specs=pl.BlockSpec((B, c_blk), lambda ci, li: (0, ci)),
        scratch_shapes=[pltpu.VMEM((B, c_blk), jnp.float32)],
    )

    return pl.pallas_call(
        _spp_fusion_kernel,
        out_shape=jax.ShapeDtypeStruct((B, C), x_nchw.dtype),
        grid_spec=grid_spec,
        compiler_params=pltpu.CompilerParams(
            dimension_semantics=("parallel", "arbitrary"),
            vmem_limit_bytes=vmem_limit,
        ),
    )(x, M, gamma, beta)


def _reference(x, conv_weight, gamma, beta):
    """Pure-JAX reference mirroring the PyTorch module (training-mode BN)."""
    B, C, H, W = x.shape
    x32 = x.astype(jnp.float32)
    p4 = x32.reshape(B, C, 4, H // 4, 4, W // 4).mean(axis=(3, 5)).reshape(B, C, 16)
    p2 = x32.reshape(B, C, 2, H // 2, 2, W // 2).mean(axis=(3, 5)).reshape(B, C, 4)
    p1 = x32.mean(axis=(2, 3)).reshape(B, C, 1)
    feats = jnp.concatenate([p4, p2, p1], axis=2)                        # (B, C, 21)
    spp = jnp.sum(feats * conv_weight[:, 0, :][None].astype(jnp.float32), axis=2)
    mean = spp.mean(axis=0, keepdims=True)
    var = ((spp - mean) ** 2).mean(axis=0, keepdims=True)
    y = (spp - mean) * jax.lax.rsqrt(var + 1e-5) * gamma[None] + beta[None]
    return jnp.maximum(y, 0.0)


if __name__ == "__main__":
    key = jax.random.PRNGKey(0)
    kx, kw = jax.random.split(key)

    B, C, H, W = 2, 16, 16, 16
    x = jax.random.normal(kx, (B, C, H, W), dtype=jnp.float32)

    # Conv1d(C, C, kernel_size=21, groups=C, bias=False) weight: (C, 1, 21)
    conv_weight = jax.random.normal(kw, (C, 1, 21), dtype=jnp.float32) * 0.1
    # BatchNorm1d default init: weight=1, bias=0
    bn_gamma = jnp.ones((C,), dtype=jnp.float32)
    bn_beta = jnp.zeros((C,), dtype=jnp.float32)

    out = spp_fusion(x, conv_weight, bn_gamma, bn_beta)
    jax.block_until_ready(out)
    assert out.shape == (B, C)

    ref = _reference(x, conv_weight, bn_gamma, bn_beta)
    assert jnp.allclose(out, ref, atol=1e-3, rtol=1e-3), "mismatch vs pure-JAX reference"
    print("KERNEL_OK")
</pallas_src>

<mosaic_0001>
module attributes {stable_mosaic.version = 11 : i64} {
  func.func @_spp_fusion_kernel(%arg0: i32, %arg1: i32, %arg2: memref<2x16x256xf32, #tpu.memory_space<vmem>>, %arg3: memref<16x256xf32, #tpu.memory_space<vmem>>, %arg4: memref<1x16xf32, #tpu.memory_space<vmem>>, %arg5: memref<1x16xf32, #tpu.memory_space<vmem>>, %arg6: memref<2x16xf32, #tpu.memory_space<vmem>>, %arg7: memref<2x16xf32, #tpu.memory_space<vmem>>) attributes {dimension_semantics = [#tpu.dimension_semantics<parallel>, #tpu.dimension_semantics<arbitrary>], iteration_bounds = array<i64: 1, 1>, scalar_prefetch = 0 : i64, scratch_operands = 1 : i64, tpu.core_type = #tpu.core_type<tc>, window_params = [{transform_indices = @transform_0, window_bounds = array<i64: 2, 16, 256>}, {transform_indices = @transform_1, window_bounds = array<i64: 16, 256>}, {transform_indices = @transform_2, window_bounds = array<i64: 1, 16>}, {transform_indices = @transform_3, window_bounds = array<i64: 1, 16>}, {transform_indices = @transform_4, window_bounds = array<i64: 2, 16>}]} {
    %c0_i32 = arith.constant 0 : i32
    %0 = arith.cmpi eq, %arg1, %c0_i32 : i32
    %1 = arith.extui %0 : i1 to i32
    %c0_i32_0 = arith.constant 0 : i32
    %2 = arith.cmpi ne, %1, %c0_i32_0 : i32
    scf.if %2 {
      %cst_11 = arith.constant 0.000000e+00 : f32
      %15 = vector.broadcast %cst_11 : f32 to vector<2x16xf32>
      %c0_12 = arith.constant 0 : index
      %c0_13 = arith.constant 0 : index
      %16 = vector.load %arg7[%c0_12, %c0_13] : memref<2x16xf32, #tpu.memory_space<vmem>>, vector<2x16xf32>
      tpu.vector_store %arg7[%c0_12, %c0_13], %15 {strides = array<i32>} : memref<2x16xf32, #tpu.memory_space<vmem>>, vector<2x16xf32>,
    } else {
    }
    %c0 = arith.constant 0 : index
    %c0_1 = arith.constant 0 : index
    %c0_2 = arith.constant 0 : index
    %3 = vector.load %arg2[%c0, %c0_1, %c0_2] : memref<2x16x256xf32, #tpu.memory_space<vmem>>, vector<2x16x256xf32>
    %c0_3 = arith.constant 0 : index
    %c0_4 = arith.constant 0 : index
    %4 = vector.load %arg3[%c0_3, %c0_4] : memref<16x256xf32, #tpu.memory_space<vmem>>, vector<16x256xf32>
    %c0_5 = arith.constant 0 : index
    %c0_6 = arith.constant 0 : index
    %5 = vector.load %arg7[%c0_5, %c0_6] : memref<2x16xf32, #tpu.memory_space<vmem>>, vector<2x16xf32>
    %6 = vector.shape_cast %4 : vector<16x256xf32> to vector<1x16x256xf32>
    %7 = vector.broadcast %6 : vector<1x16x256xf32> to vector<2x16x256xf32>
    %8 = arith.mulf %3, %7 : vector<2x16x256xf32>
    %cst = arith.constant dense<0.000000e+00> : vector<2x16xf32>
    %9 = vector.multi_reduction <add>, %8, %cst [2] : vector<2x16x256xf32> to vector<2x16xf32>
    %10 = arith.addf %5, %9 : vector<2x16xf32>
    %c0_7 = arith.constant 0 : index
    %c0_8 = arith.constant 0 : index
    %11 = vector.load %arg7[%c0_7, %c0_8] : memref<2x16xf32, #tpu.memory_space<vmem>>, vector<2x16xf32>
    tpu.vector_store %arg7[%c0_7, %c0_8], %10 {strides = array<i32>} : memref<2x16xf32, #tpu.memory_space<vmem>>, vector<2x16xf32>,
    %c0_i32_9 = arith.constant 0 : i32
    %12 = arith.cmpi eq, %arg1, %c0_i32_9 : i32
    %13 = arith.extui %12 : i1 to i32
    %c0_i32_10 = arith.constant 0 : i32
    %14 = arith.cmpi ne, %13, %c0_i32_10 : i32
    scf.if %14 {
      %c0_11 = arith.constant 0 : index
      %c0_12 = arith.constant 0 : index
      %15 = vector.load %arg7[%c0_11, %c0_12] : memref<2x16xf32, #tpu.memory_space<vmem>>, vector<2x16xf32>
      %cst_13 = arith.constant dense<0.000000e+00> : vector<16xf32>
      %16 = vector.multi_reduction <add>, %15, %cst_13 [0] : vector<2x16xf32> to vector<16xf32>
      %17 = vector.shape_cast %16 : vector<16xf32> to vector<1x16xf32>
      %cst_14 = arith.constant 2.000000e+00 : f32
      %18 = vector.broadcast %cst_14 : f32 to vector<1x16xf32>
      %19 = arith.divf %17, %18 : vector<1x16xf32>
      %20 = vector.broadcast %19 : vector<1x16xf32> to vector<2x16xf32>
      %21 = arith.subf %15, %20 : vector<2x16xf32>
      %22 = arith.mulf %21, %21 : vector<2x16xf32>
      %cst_15 = arith.constant dense<0.000000e+00> : vector<16xf32>
      %23 = vector.multi_reduction <add>, %22, %cst_15 [0] : vector<2x16xf32> to vector<16xf32>
      %24 = vector.shape_cast %23 : vector<16xf32> to vector<1x16xf32>
      %cst_16 = arith.constant 2.000000e+00 : f32
      %25 = vector.broadcast %cst_16 : f32 to vector<1x16xf32>
      %26 = arith.divf %24, %25 : vector<1x16xf32>
      %27 = vector.broadcast %19 : vector<1x16xf32> to vector<2x16xf32>
      %28 = arith.subf %15, %27 : vector<2x16xf32>
      %cst_17 = arith.constant 9.99999974E-6 : f32
      %29 = vector.broadcast %cst_17 : f32 to vector<1x16xf32>
      %30 = arith.addf %26, %29 : vector<1x16xf32>
      %31 = math.rsqrt %30 : vector<1x16xf32>
      %32 = vector.broadcast %31 : vector<1x16xf32> to vector<2x16xf32>
      %33 = arith.mulf %28, %32 : vector<2x16xf32>
      %c0_18 = arith.constant 0 : index
      %c0_19 = arith.constant 0 : index
      %34 = vector.load %arg4[%c0_18, %c0_19] : memref<1x16xf32, #tpu.memory_space<vmem>>, vector<1x16xf32>
      %35 = vector.broadcast %34 : vector<1x16xf32> to vector<2x16xf32>
      %36 = arith.mulf %33, %35 : vector<2x16xf32>
      %c0_20 = arith.constant 0 : index
      %c0_21 = arith.constant 0 : index
      %37 = vector.load %arg5[%c0_20, %c0_21] : memref<1x16xf32, #tpu.memory_space<vmem>>, vector<1x16xf32>
      %38 = vector.broadcast %37 : vector<1x16xf32> to vector<2x16xf32>
      %39 = arith.addf %36, %38 : vector<2x16xf32>
      %cst_22 = arith.constant 0.000000e+00 : f32
      %40 = vector.broadcast %cst_22 : f32 to vector<2x16xf32>
      %41 = arith.maximumf %39, %40 : vector<2x16xf32>
      %c0_23 = arith.constant 0 : index
      %c0_24 = arith.constant 0 : index
      %42 = vector.load %arg6[%c0_23, %c0_24] : memref<2x16xf32, #tpu.memory_space<vmem>>, vector<2x16xf32>
      tpu.vector_store %arg6[%c0_23, %c0_24], %41 {strides = array<i32>} : memref<2x16xf32, #tpu.memory_space<vmem>>, vector<2x16xf32>,
    } else {
    }
    return
  }
  func.func @transform_0(%arg0: i32, %arg1: i32) -> (i32, i32, i32) {
    %c0_i32 = arith.constant 0 : i32
    %c0_i32_0 = arith.constant 0 : i32
    return %c0_i32, %arg0, %arg1 : i32, i32, i32
  }
  func.func @transform_1(%arg0: i32, %arg1: i32) -> (i32, i32) {
    %c0_i32 = arith.constant 0 : i32
    return %arg0, %arg1 : i32, i32
  }
  func.func @transform_2(%arg0: i32, %arg1: i32) -> (i32, i32) {
    %c0_i32 = arith.constant 0 : i32
    %c0_i32_0 = arith.constant 0 : i32
    return %c0_i32, %arg0 : i32, i32
  }
  func.func @transform_3(%arg0: i32, %arg1: i32) -> (i32, i32) {
    %c0_i32 = arith.constant 0 : i32
    %c0_i32_0 = arith.constant 0 : i32
    return %c0_i32, %arg0 : i32, i32
  }
  func.func @transform_4(%arg0: i32, %arg1: i32) -> (i32, i32) {
    %c0_i32 = arith.constant 0 : i32
    %c0_i32_0 = arith.constant 0 : i32
    return %c0_i32, %arg0 : i32, i32
  }
}

</mosaic_0001>

<bundles_post_ra>
// kernel: tpu_custom_call.1
= control target key start
LH: loop header
LB: loop body
LE: loop exit
PB: predicated region body
PF: predicated region fallthrough
CT: control target
= control target key end

     0   :  { %9 = vsyncpa [#allocation4], 0  ;;  %s304_s0 = inlined_call_operand.hbm [shape: f32[2,16,256], index: 0, kind: input, shape index: {}]   ;;  %s305_s1 = inlined_call_operand.hbm [shape: f32[16,256], index: 1, kind: input, shape index: {}]   ;;  %s306_s2 = inlined_call_operand.vmem [shape: f32[1,16], index: 2, kind: input, shape index: {}]   ;;  %s307_s3 = inlined_call_operand.vmem [shape: f32[1,16], index: 3, kind: input, shape index: {}]   ;;  %s308_s4 = inlined_call_operand.hbm [shape: f32[2,16], index: 4, kind: output, shape index: {}]  }
   0x1   :  { %10 = vsyncpa [#allocation7], 0 }
   0x2   :  { %11 = vsyncpa [#allocation5], 0  ;;  %s253_s15 = smov [#allocation3]  }
   0x3   :  { %s17_s16 = sshll.u32 %s253_s15, 4  ;;  %s18_s16 = int_to_ptr.vmem [resolvable:$true] %s17_s16 }
   0x4   :  { %s195_s17 = scalar_lea.vmem %s18_s16, 1024  ;;  %p200_p1 = scmp.lt.s32.totalorder %s18_s16, %s18_s16 }
   0x5   :  { %p196_p0 = scmp.ne.s32.totalorder %s18_s16, %s195_s17  ;;  %p201_p2 = scmp.lt.s32.totalorder %s195_s17, %s195_s17 }
   0x7   :  { %p202_p3 = por %p201_p2, %p200_p1 }
   0x9   :  { %p203_p4 = pnand %p202_p3, %p196_p0 }
   0xb   :  { %206 = shalt.err (!%p203_p4)
}
   0xc   :  { %s254_s18 = smov 256   ;;  %s255_s19 = smov 16  }
   0xd   :  { %23 = dma.hbm_to_vmem [thread:$0]  %s304_s0, 1024, %s18_s16, [#allocation4], %s254_s18, %s254_s18, %s255_s19  }
   0xe   :  { %s256_s22 = smov [#allocation6]  }
   0xf   :  { %s29_s23 = sshll.u32 %s256_s22, 4  ;;  %s30_s23 = int_to_ptr.vmem [resolvable:$true] %s29_s23 }
  0x10   :  { %s215_s24 = scalar_lea.vmem %s30_s23, 512  ;;  %p220_p6 = scmp.lt.s32.totalorder %s30_s23, %s30_s23 }
  0x11   :  { %p216_p5 = scmp.ne.s32.totalorder %s30_s23, %s215_s24  ;;  %p221_p7 = scmp.lt.s32.totalorder %s215_s24, %s215_s24 }
  0x13   :  { %p222_p8 = por %p221_p7, %p220_p6 }
  0x15   :  { %p223_p9 = pnand %p222_p8, %p216_p5 }
  0x17   :  { %226 = shalt.err (!%p223_p9)
}
  0x18   :  { %35 = dma.hbm_to_vmem [thread:$0]  %s305_s1, 512, %s30_s23, [#allocation7], %s254_s18, %s254_s18, %s255_s19  }
  0x19   :  { %247 = dma.done.wait [#allocation4], 1024  }
  0x1a   :  { %248 = vsyncadd [#allocation4], 4294966272 }
  0x1b   :  { %249 = dma.done.wait [#allocation7], 512  }
  0x1c   :  { %250 = vsyncadd [#allocation7], 4294966784  ;;  %v56_v0 = vld [vmem:[#allocation3 + $0x20] sm:$0xff]  ;;  %v57_v1 = vld [vmem:[#allocation3 + $0x28] sm:$0xff]  ;;  %vm50_vm0 = vcmask 123904   ;;  %v257_v24 = vmov 0.0   ;;  %v89_v25 = vlaneseq }
  0x1d   :  { %v60_v2 = vld [vmem:[#allocation6] sm:$0xff]  ;;  %v61_v3 = vld [vmem:[#allocation6 + $0x8] sm:$0xff]  ;;  %v58_v10 = vld [vmem:[#allocation3 + $0x30] sm:$0xff]  ;;  %51 = vst.msk [vmem:[#allocation2] sm:$0x3] %vm50_vm0, %v257_v24  ;;  %vm100_vm1 = vcmask 130112  }
  0x1e   :  { %v69_v4 = vmul.f32 %v60_v2, %v56_v0  ;;  %v52_v5 = vld [vmem:[#allocation3] sm:$0xff]  ;;  %v53_v6 = vld [vmem:[#allocation3 + $0x8] sm:$0xff]  ;;  %v70_v7 = vmul.f32 %v61_v3, %v57_v1  ;;  %v59_v11 = vld [vmem:[#allocation3 + $0x38] sm:$0xff]  ;;  %v90_v26 = vand.u32 127, %v89_v25  ;;  %v92_v27 = vshrl.u32 %v89_v25, 7  ;;  %s258_s29 = smov [#allocation8]  }
  0x1f   :  { %v65_v8 = vmul.f32 %v60_v2, %v52_v5  ;;  %v66_v9 = vmul.f32 %v61_v3, %v53_v6  ;;  %v62_v12 = vld [vmem:[#allocation6 + $0x10] sm:$0xff]  ;;  %v63_v13 = vld [vmem:[#allocation6 + $0x18] sm:$0xff]  ;;  %vm111_vm2 = vcmask 1041409   ;;  %s167_s30 = sshll.u32 %s258_s29, 4  ;;  %s168_s30 = int_to_ptr.vmem [resolvable:$true] %s167_s30 }
  0x20   :  { %v71_v14 = vmul.f32 %v62_v12, %v58_v10  ;;  %v54_v15 = vld [vmem:[#allocation3 + $0x10] sm:$0xff]  ;;  %v55_v16 = vld [vmem:[#allocation3 + $0x18] sm:$0xff]  ;;  %v79_v17 = vadd.f32 %v70_v7, %v69_v4  ;;  %v72_v19 = vmul.f32 %v63_v13, %v59_v11  ;;  %v95_v28 = vadd.s32 4294967288, %v90_v26  ;;  %s227_s5 = scalar_lea.vmem %s168_s30, 32  ;;  %p232_p11 = scmp.lt.s32.totalorder %s168_s30, %s168_s30 }
  0x21   :  { %v73_v18 = vadd.f32 %v66_v9, %v65_v8  ;;  %v67_v20 = vmul.f32 %v62_v12, %v54_v15  ;;  %v68_v21 = vmul.f32 %v63_v13, %v55_v16  ;;  %v93_v31 = vsub.s32 %v90_v26, %v92_v27  ;;  %v177_v1 = vld [vmem:[%s306_s2] ss:$0 sm:$0xff]  ;;  %p228_p10 = scmp.ne.s32.totalorder %s168_s30, %s227_s5  ;;  %p233_p12 = scmp.lt.s32.totalorder %s227_s5, %s227_s5 }
  0x22   :  { %80 = vadd.xlane.f32.xlu1 %v79_v17  ;;  %v82_v22 = vadd.f32 %v72_v19, %v71_v14  ;;  %v98_v32 = vsub.s32 %v95_v28, %v92_v27  ;;  %v178_v3 = vld [vmem:[%s307_s3] ss:$0 sm:$0xff] }
  0x23   :  { %74 = vadd.xlane.f32.xlu0 %v73_v18  ;;  %v76_v23 = vadd.f32 %v68_v21, %v67_v20  ;;  %p234_p13 = por %p233_p12, %p232_p11 }
  0x24   :  { %v64_v39 = vld [vmem:[#allocation2] sm:$0x3] }
  0x25   :  { %p235_p0 = pnand %p234_p13, %p228_p10 }
  0x26   :  { %83 = vadd.xlane.f32.xlu1 %v82_v22 }
  0x27   :  { %77 = vadd.xlane.f32.xlu0 %v76_v23 }
  0xab   :  { %v81_v29 = vpop.xlane.xlu1 %80 }
  0xac   :  { %v75_v30 = vpop.xlane.xlu0 %74  ;;  %v105_v35 = vrot.slane %v81_v29, %v93_v31 }
  0xad   :  { %v94_v36 = vrot.slane %v75_v30, %v93_v31 }
  0xaf   :  { %v84_v33 = vpop.xlane.xlu1 %83 }
  0xb0   :  { %v78_v34 = vpop.xlane.xlu0 %77  ;;  %v109_v37 = vrot.slane %v84_v33, %v98_v32 }
  0xb1   :  { %v99_v38 = vrot.slane %v78_v34, %v98_v32 }
  0xb2   :  { %v110_v40 = vsel %vm100_vm1, %v109_v37, %v105_v35 }
  0xb3   :  { %v101_v41 = vsel %vm100_vm1, %v99_v38, %v94_v36 }
  0xb4   :  { %v112_v42 = vsel %vm111_vm2, %v110_v40, %v101_v41 }
  0xb5   :  { %v114_v43 = vadd.f32 %v112_v42, %v64_v39 }
  0xb7   :  { %116 = vst.msk [vmem:[#allocation2] sm:$0x3] %vm50_vm0, %v114_v43 }
  0xbe   :  { %v120_v44 = vld [vmem:[#allocation2] sm:$0x3] }
  0xbf   :  { %v121_v45 = vsel %vm50_vm0, %v120_v44, 0.0 }
  0xc0   :  { %v122_v46 = vrot.slane %v121_v45, 4 }
  0xc2   :  { %v123_v47 = vadd.f32 %v122_v46, %v121_v45 }
  0xc4   :  { %v124_v48 = vrot.slane %v123_v47, 2 }
  0xc6   :  { %v125_v49 = vadd.f32 %v124_v48, %v123_v47 }
  0xc8   :  { %v126_v50 = vrot.slane %v125_v49, 1 }
  0xca   :  { %v127_v51 = vadd.f32 %v126_v50, %v125_v49 }
  0xcc   :  { %v129_v52 = vmul.f32 0.5, %v127_v51 }
  0xce   :  { %v130_v53 = vsub.f32 %v120_v44, %v129_v52 }
  0xd0   :  { %v131_v54 = vmul.f32 %v130_v53, %v130_v53 }
  0xd2   :  { %v132_v55 = vsel %vm50_vm0, %v131_v54, 0.0 }
  0xd3   :  { %v133_v56 = vrot.slane %v132_v55, 4 }
  0xd5   :  { %v134_v57 = vadd.f32 %v133_v56, %v132_v55 }
  0xd7   :  { %v135_v58 = vrot.slane %v134_v57, 2 }
  0xd9   :  { %v136_v59 = vadd.f32 %v135_v58, %v134_v57 }
  0xdb   :  { %v137_v60 = vrot.slane %v136_v59, 1 }
  0xdd   :  { %v138_v61 = vadd.f32 %v137_v60, %v136_v59 }
  0xdf   :  { %v139_v62 = vmul.f32 0.5, %v138_v61 }
  0xe1   :  { %v140_v63 = vadd.f32 1e-05, %v139_v62 }
  0xe3   :  { %185 = vrsqrt.f32 %v140_v63 }
  0xf0   :  { %v186_v0 = vpop.eup %185 }
  0xf1   :  { %v142_v2 = vmul.f32 %v186_v0, %v130_v53 }
  0xf3   :  { %v150_v4 = vmul.f32 %v177_v1, %v142_v2 }
  0xf5   :  { %v158_v5 = vadd.f32 %v178_v3, %v150_v4 }
  0xf7   :  { %v159_v6 = vmax.f32 %v158_v5, 0.0 }
  0xf9   :  { %160 = vst.msk [vmem:[#allocation8] sm:$0x3] %vm50_vm0, %v159_v6 }
  0xfa   :  { %238 = shalt.err (!%p235_p0)
}
  0xfb   :  { %170 = dma.vmem_to_hbm [thread:$0]  %s168_s30, 32, %s308_s4, [#allocation5]  }
  0xfc   :  { %251 = dma.done.wait [#allocation5], 32  }
  0xfd   :  { %252 = vsyncadd [#allocation5], 4294967264 }
  0xfe   :  { %174 = vsyncpa [#allocation4], 1 }
  0xff   :  { %175 = vsyncpa [#allocation7], 1 }
 0x100   :  { %176 = vsyncpa [#allocation5], 1 }

</bundles_post_ra>
